<compile_context>
chip_gen: v7x
topology: tpu7x:2x2x1
jax: 0.10.0
libtpu: 0.0.40
codegen_flags: <defaults>
</compile_context>

<pallas_src>
import jax
import jax.numpy as jnp
from jax import lax
from jax.experimental import pallas as pl
from jax.experimental.pallas import tpu as pltpu


def embed_kernel(x_ref, w_ref, pe_ref, o_ref):
    # x_ref : (1, C, tS)  channels-first token slab (lane-dense loads)
    # w_ref : (C, D)      conv weight reshaped for right-matmul (resident)
    # pe_ref: (tS, D)     positional-embedding tile with conv bias pre-folded
    # o_ref : (1, tS, D)
    x = x_ref[0]                                             # (C, tS)
    # Contract the channel axis directly: (C, tS) x (C, D) -> (tS, D) on the MXU.
    y = lax.dot_general(
        x, w_ref[...],
        dimension_numbers=(((0,), (0,)), ((), ())),
        preferred_element_type=jnp.float32)                  # (tS, D)
    o_ref[0] = (y + pe_ref[...]).astype(o_ref.dtype)


def _pick_seq_tile(S, C, D, itemsize, *, max_tile=2048, budget_bytes=8 << 20):
    """Largest multiple-of-128 divisor of S (<= max_tile) whose double-buffered
    working set (x tile + out tile + pe tile, x2) + weight fits the budget."""
    best = None
    ts = 128
    while ts <= min(S, max_tile):
        if S % ts == 0:
            need = itemsize * (2 * (C * ts + 2 * ts * D) + C * D)
            if need <= budget_bytes:
                best = ts
        ts += 128
    return best if best is not None else S   # tS == S is always a legal block


def embedding_block_forward(x_nchw, conv_w, conv_b, pos_emb_table, patch_size,
                            *, seq_tile=None):
    B, C, H, W = x_nchw.shape
    D = conv_w.shape[0]
    # The original forward is only well-defined in this regime (see header).
    assert patch_size == 1 and D == C, \
        "reference forward only type-checks for patch_size=1, hidden_dim=channels"
    assert H % patch_size == 0 and W % patch_size == 0, \
        "Height and width must be divisible by patch size."
    S = H * W
    assert pos_emb_table.shape == (S, D)

    # Glue (free / one-time):
    #  * NCHW -> (B, C, S): contiguous reshape, NO extra HBM transpose pass.
    #  * conv weight (D, C, 1, 1) -> (C, D).
    #  * fold conv bias into the positional embedding (amortized over B).
    x_cs = x_nchw.reshape(B, C, S)
    w_mat = jnp.transpose(conv_w[:, :, 0, 0])        # (C, D)
    pe_plus_b = pos_emb_table + conv_b[None, :]      # (S, D)

    itemsize = jnp.dtype(x_nchw.dtype).itemsize
    tS = seq_tile if seq_tile is not None else _pick_seq_tile(S, C, D, itemsize)
    assert S % tS == 0, "sequence tile must divide the sequence length"
    n_s = S // tS

    # Explicit scoped-VMEM limit with headroom (sized for v7x's 64 MiB VMEM).
    block_bytes = itemsize * (2 * (C * tS + 2 * tS * D) + C * D)
    vmem_limit = int(min(32 * 2**20, max(16 * 2**20, 3 * block_bytes)))

    out = pl.pallas_call(
        embed_kernel,
        out_shape=jax.ShapeDtypeStruct((B, S, D), x_nchw.dtype),
        grid_spec=pltpu.PrefetchScalarGridSpec(
            num_scalar_prefetch=0,
            grid=(B, n_s),
            in_specs=[
                pl.BlockSpec((1, C, tS), lambda b, s: (b, 0, s)),  # token slab
                pl.BlockSpec((C, D), lambda b, s: (0, 0)),         # weight (resident)
                pl.BlockSpec((tS, D), lambda b, s: (s, 0)),        # pos-emb (+bias) tile
            ],
            out_specs=pl.BlockSpec((1, tS, D), lambda b, s: (b, s, 0)),
        ),
        compiler_params=pltpu.CompilerParams(
            dimension_semantics=("parallel", "parallel"),
            vmem_limit_bytes=vmem_limit),
    )(x_cs, w_mat, pe_plus_b)
    return out


if __name__ == "__main__":
    # Small shapes consistent with the module's constraints:
    # patch_size=1, channels == hidden_dim = 128 (lane-dense output),
    # H=W=16 -> seq_len = 256, so the S-tile grid axis is exercised.
    patch_size = 1
    B, C, H, W = 2, 128, 16, 16
    hidden_dim = C * patch_size ** 2          # = 128
    seq_len = (H * W) // patch_size ** 2      # = 256

    key = jax.random.PRNGKey(0)
    kx, kw, kb, kpe = jax.random.split(key, 4)

    x = jax.random.normal(kx, (B, C, H, W), jnp.float32)
    # Conv2d(C, hidden_dim, kernel_size=patch_size, stride=patch_size) params.
    conv_w = jax.random.normal(kw, (hidden_dim, C, patch_size, patch_size),
                               jnp.float32) * 0.05
    conv_b = jax.random.normal(kb, (hidden_dim,), jnp.float32) * 0.05
    # nn.Embedding(seq_len, hidden_dim) weight; forward does an identity gather
    # with arange(seq_len), so the whole table is the positional embedding.
    pos_emb_table = jax.random.normal(kpe, (seq_len, hidden_dim), jnp.float32)
    # TODO(synk): self.proj = nn.Linear(...) is defined but unused in forward;
    # intentionally not materialized.

    out = embedding_block_forward(x, conv_w, conv_b, pos_emb_table, patch_size)
    out = jax.block_until_ready(out)

    # Pure-JAX reference of the exact PyTorch forward (patch_size=1 regime).
    x_seq = jnp.transpose(x, (0, 2, 3, 1)).reshape(B, H * W, C)
    ref = (jnp.einsum("bsc,cd->bsd", x_seq, conv_w[:, :, 0, 0].T)
           + conv_b[None, None, :] + pos_emb_table[None])
    assert out.shape == (B, seq_len, hidden_dim)
    assert jnp.allclose(out, ref, atol=2e-4, rtol=2e-4)

    print("KERNEL_OK")
</pallas_src>

<mosaic_0001>
module attributes {stable_mosaic.version = 11 : i64} {
  func.func @embed_kernel(%arg0: i32, %arg1: i32, %arg2: memref<1x128x256xf32, #tpu.memory_space<vmem>>, %arg3: memref<128x128xf32, #tpu.memory_space<vmem>>, %arg4: memref<256x128xf32, #tpu.memory_space<vmem>>, %arg5: memref<1x256x128xf32, #tpu.memory_space<vmem>>) attributes {dimension_semantics = [#tpu.dimension_semantics<parallel>, #tpu.dimension_semantics<parallel>], iteration_bounds = array<i64: 2, 1>, scalar_prefetch = 0 : i64, scratch_operands = 0 : i64, tpu.core_type = #tpu.core_type<tc>, window_params = [{transform_indices = @transform_0, window_bounds = array<i64: 1, 128, 256>}, {pipeline_mode = #tpu.pipeline_mode<synchronous>, transform_indices = @transform_1, window_bounds = array<i64: 128, 128>}, {transform_indices = @transform_2, window_bounds = array<i64: 256, 128>}, {transform_indices = @transform_3, window_bounds = array<i64: 1, 256, 128>}]} {
    %c0 = arith.constant 0 : index
    %c0_0 = arith.constant 0 : index
    %c0_1 = arith.constant 0 : index
    %0 = vector.load %arg2[%c0, %c0_0, %c0_1] : memref<1x128x256xf32, #tpu.memory_space<vmem>>, vector<1x128x256xf32>
    %1 = vector.shape_cast %0 : vector<1x128x256xf32> to vector<128x256xf32>
    %c0_2 = arith.constant 0 : index
    %c0_3 = arith.constant 0 : index
    %2 = vector.load %arg3[%c0_2, %c0_3] : memref<128x128xf32, #tpu.memory_space<vmem>>, vector<128x128xf32>
    %cst = arith.constant dense<0.000000e+00> : vector<256x128xf32>
    %3 = tpu.matmul %1, %2, %cst {dimension_numbers = #tpu.dot_dimension_numbers<[0], [0], [1], [1], [0, 1, 1, 1], [], []>} : vector<128x256xf32>, vector<128x128xf32>, vector<256x128xf32> -> vector<256x128xf32>
    %c0_4 = arith.constant 0 : index
    %c0_5 = arith.constant 0 : index
    %4 = vector.load %arg4[%c0_4, %c0_5] : memref<256x128xf32, #tpu.memory_space<vmem>>, vector<256x128xf32>
    %5 = arith.addf %3, %4 : vector<256x128xf32>
    %c0_6 = arith.constant 0 : index
    %c0_7 = arith.constant 0 : index
    %c0_8 = arith.constant 0 : index
    %6 = vector.load %arg5[%c0_6, %c0_7, %c0_8] : memref<1x256x128xf32, #tpu.memory_space<vmem>>, vector<1x256x128xf32>
    %7 = vector.shape_cast %6 : vector<1x256x128xf32> to vector<256x128xf32>
    %8 = vector.shape_cast %5 : vector<256x128xf32> to vector<1x256x128xf32>
    tpu.vector_store %arg5[%c0_6, %c0_7, %c0_8], %8 {strides = array<i32>} : memref<1x256x128xf32, #tpu.memory_space<vmem>>, vector<1x256x128xf32>,
    return
  }
  func.func @transform_0(%arg0: i32, %arg1: i32) -> (i32, i32, i32) {
    %c0_i32 = arith.constant 0 : i32
    %c0_i32_0 = arith.constant 0 : i32
    return %arg0, %c0_i32, %arg1 : i32, i32, i32
  }
  func.func @transform_1(%arg0: i32, %arg1: i32) -> (i32, i32) {
    %c0_i32 = arith.constant 0 : i32
    %c0_i32_0 = arith.constant 0 : i32
    %c0_i32_1 = arith.constant 0 : i32
    return %c0_i32, %c0_i32_0 : i32, i32
  }
  func.func @transform_2(%arg0: i32, %arg1: i32) -> (i32, i32) {
    %c0_i32 = arith.constant 0 : i32
    %c0_i32_0 = arith.constant 0 : i32
    return %arg1, %c0_i32 : i32, i32
  }
  func.func @transform_3(%arg0: i32, %arg1: i32) -> (i32, i32, i32) {
    %c0_i32 = arith.constant 0 : i32
    %c0_i32_0 = arith.constant 0 : i32
    return %arg0, %arg1, %c0_i32 : i32, i32, i32
  }
}

</mosaic_0001>

<bundles_post_ra>
// kernel: tpu_custom_call.1
= control target key start
LH: loop header
LB: loop body
LE: loop exit
PB: predicated region body
PF: predicated region fallthrough
CT: control target
= control target key end

     0   :  { %8 = vsyncpa [#allocation3], 0  ;;  %s1702_s0 = inlined_call_operand.hbm [shape: f32[2,128,256], index: 0, kind: input, shape index: {}]   ;;  %s1703_s1 = inlined_call_operand.hbm [shape: f32[128,128], index: 1, kind: input, shape index: {}]   ;;  %s1704_s2 = inlined_call_operand.hbm [shape: f32[256,128], index: 2, kind: input, shape index: {}]   ;;  %s1705_s3 = inlined_call_operand.hbm [shape: f32[2,256,128], index: 3, kind: output, shape index: {}]  }
   0x1   :  { %10 = vsyncpa [#allocation3 + $0x1], 0 }
   0x2   :  { %11 = vsyncpa [#allocation6], 0 }
   0x3   :  { %12 = vsyncpa [#allocation4], 0 }
   0x4   :  { %14 = vsyncpa [#allocation4 + $0x1], 0  ;;  %s1374_s12 = smov 0   ;;  %s1376_s13 = smov 0  }
   0x5   :  { %s1378_s14 = smov 0   ;;  %s1380_s15 = smov 0  }
   0x6   :  { %s1382_s16 = smov 0   ;;  %s1384_s17 = smov 0  }
   0x7 LB: > { %s772_s18 = sadd.s32 4294967295, %s1342_s17   ;;  %s773_s19 = sadd.s32 4294967294, %s1342_s17   ;;  %s1342_s17 = sphi %s1384_s17, %s20_s17   ;;  %s1338_s16 = sphi %s1382_s16, %s1727_s16   ;;  %s1334_s15 = sphi %s1380_s15, %s1726_s15   ;;  %s1330_s14 = sphi %s1378_s14, %s1725_s14   ;;  %s1326_s13 = sphi %s1376_s13, %s1724_s13   ;;  %s1322_s12 = sphi %s1374_s12, %s1723_s12  }
   0x8   : > { %p54_p0 = scmp.ne.s32.totalorder %s1326_s13, %s1322_s12  ;;  %p1408_p1 = scmp.eq.s32.totalorder %s772_s18, 0 }
   0x9   : > { %p1412_p2 = scmp.eq.s32.totalorder %s772_s18, 1  ;;  %p133_p3 = scmp.eq.s32.totalorder %s773_s19, 1 }
   0xa   : > { %s1710_s20 = scalar_select %p1408_p1, 1, 0 }
   0xb   : > { %p1418_p4 = por %p1408_p1, %p54_p0  ;;  %p774_p5 = scmp.ge.s32.totalorder %s1342_s17, 1 }
   0xc   : > { %p1423_p6 = por %p133_p3, %p54_p0  ;;  %p140_p7 = scmp.lt.s32.totalorder %s1342_s17, 3 }
   0xd   : > { %s1712_s22 = scalar_select %p1418_p4, 1, 0 }
   0xe   : > { %s1713_s23 = scalar_select %p1423_p6, 1, 0 }
   0xf   : > { %p1428_p8 = pnand %p774_p5, %p140_p7  ;;  %s1344_s25 = smov [#allocation5]  }
  0x10   : > { %s152_s26 = sshll.u32 %s1344_s25, 4  ;;  %s1345_s28 = smov [#allocation7]   ;;  %s1432_s26 = int_to_ptr.vmem [resolvable:$true] %s152_s26 }
  0x11   : > { %p981_p9 = pneg %p1428_p8  ;;  %s168_s29 = sshll.u32 %s1345_s28, 4  ;;  %s1443_s29 = int_to_ptr.vmem [resolvable:$true] %s168_s29 }
  0x12   : > { %s1170_s5 = scalar_lea.hbm %s1703_s1, 2048 }
  0x13   : > { %p1439_p11 = pnand %p981_p9, %p1408_p1  ;;  %p1171_p12 = scmp.ne.s32.totalorder %s1703_s1, %s1170_s5 }
  0x14   : > { %p1177_p5 = scmp.lt.u32.totalorder %s1170_s5, %s1703_s1 }
  0x15   : > { %p1172_p13 = pneg %p1439_p11 }
  0x17   : > { %p1173_p0 = pnand %p1172_p13, %p1171_p12 }
  0x19   : > { %p1174_p3 = pneg %p1173_p0 }
  0x1b   : > { %p1179_p7 = pnand %p1177_p5, %p1174_p3 }
  0x1d   : > { %1182 = shalt.err (!%p1179_p7)
}
  0x1e   : > { %s1183_s10 = scalar_lea.vmem %s1432_s26, 2048  ;;  %p1191_p1 = scmp.lt.s32.totalorder %s1432_s26, %s1432_s26 }
  0x1f   : > { %p1184_p9 = scmp.ne.s32.totalorder %s1432_s26, %s1183_s10  ;;  %p1192_p12 = scmp.lt.s32.totalorder %s1183_s10, %s1183_s10 }
  0x21   : > { %p1186_p10 = pnand %p1184_p9, %p1172_p13  ;;  %p1193_p0 = por %p1192_p12, %p1191_p1 }
  0x23   : > { %p1187_p6 = pneg %p1186_p10 }
  0x25   : > { %p1194_p4 = pnand %p1193_p0, %p1187_p6 }
  0x27   : > { %1197 = shalt.err (!%p1194_p4)
}
  0x28   : > { %s1346_s11 = smov 128   ;;  %s1347_s18 = smov 8  }
  0x29   : > { %984 = dma.hbm_to_vmem [thread:$0]  (!%p1439_p11), %s1703_s1, 2048, %s1432_s26, [#allocation6], %s1346_s11, %s1346_s11, %s1347_s18  }
  0x2a   : > { %s1198_s4 = scalar_lea.hbm %s1704_s2, 4096 }
  0x2b   : > { %p1199_p1 = scmp.ne.s32.totalorder %s1704_s2, %s1198_s4  ;;  %p1205_p10 = scmp.lt.u32.totalorder %s1198_s4, %s1704_s2 }
  0x2d   : > { %p1201_p4 = pnand %p1199_p1, %p1172_p13 }
  0x2f   : > { %p1202_p6 = pneg %p1201_p4 }
  0x31   : > { %p1207_p3 = pnand %p1205_p10, %p1202_p6 }
  0x33   : > { %1210 = shalt.err (!%p1207_p3)
}
  0x34   : > { %s1211_s26 = scalar_lea.vmem %s1443_s29, 4096  ;;  %p1219_p12 = scmp.lt.s32.totalorder %s1443_s29, %s1443_s29 }
  0x35   : > { %p1212_p5 = scmp.ne.s32.totalorder %s1443_s29, %s1211_s26  ;;  %p1220_p0 = scmp.lt.s32.totalorder %s1211_s26, %s1211_s26 }
  0x37   : > { %p1214_p7 = pnand %p1212_p5, %p1172_p13  ;;  %p1221_p1 = por %p1220_p0, %p1219_p12 }
  0x39   : > { %p1215_p9 = pneg %p1214_p7 }
  0x3b   : > { %p1222_p4 = pnand %p1221_p1, %p1215_p9 }
  0x3d   : > { %1225 = shalt.err (!%p1222_p4)
}
  0x3e   : > { %987 = dma.hbm_to_vmem [thread:$0]  (!%p1439_p11), %s1704_s2, 4096, %s1443_s29, [#allocation6], %s1346_s11, %s1346_s11, %s1347_s18  }
  0x3f   : > { %s32_s19 = sadd.s32 1, %s1338_s16  ;;  %s41_s25 = sadd.s32 1, %s1330_s14 }
  0x40   : > { %p34_p13 = scmp.ge.s32.totalorder %s32_s19, 2  ;;  %p48_p6 = scmp.ne.s32.totalorder %s1330_s14, %s1326_s13 }
  0x41   : > { %p49_p10 = scmp.eq.s32.totalorder %s1342_s17, 0  ;;  %p998_p3 = scmp.lt.s32.totalorder %s1342_s17, 2 }
  0x42   : > { %s1729_s19 = smov (%p34_p13, %s32_s19), 0  ;;  %p1507_p7 = por %p1412_p2, %p48_p6 }
  0x43   : > { %p50_p5 = por %p49_p10, %p48_p6  ;;  %s36_s28 = ssub.s32 %s1338_s16, %s1729_s19 }
  0x44   : > { %s1716_s27 = scalar_select %p1507_p7, 1, 0 }
  0x45   : > { %s182_s30 = sand.u32 1, %s1330_s14   ;;  %p39_p9 = scmp.eq.s32.totalorder %s36_s28, 0 }
  0x46   : > { %s778_s29 = sshll.u32 %s182_s30, 8  ;;  %s791_s11 = sshll.u32 %s1338_s16, 12 }
  0x47   : > { %s1516_s18 = scalar_select %p39_p9, %s1330_s14, %s41_s25  }
  0x48   : > { %s1521_s6 = scalar_lea.hbm %s1702_s0, %s791_s11  ;;  %s186_s21 = scalar_lea.vmem [#allocation2], %s778_s29 }
  0x49   : > { %s195_s7 = sshll.u32 %s186_s21, 4  ;;  %p1525_p2 = pnand %p998_p3, %p50_p5  ;;  %s1529_s7 = int_to_ptr.vmem [resolvable:$true] %s195_s7 }
  0x4a   : > { %s1531_s26 = scalar_lea.sflag [#allocation3], %s182_s30  ;;  %s1226_s9 = scalar_lea.hbm %s1521_s6, 4096 }
  0x4b   : > { %p1227_p11 = scmp.ne.s32.totalorder %s1521_s6, %s1226_s9  ;;  %p1228_p12 = pneg %p1525_p2 }
  0x4c   : > { %s1231_s28 = scalar_lea.hbm %s1702_s0, 8192  ;;  %p1232_p4 = scmp.lt.u32.totalorder %s1521_s6, %s1702_s0 }
  0x4d   : > { %p1229_p0 = pnand %p1228_p12, %p1227_p11  ;;  %p1233_p13 = scmp.lt.u32.totalorder %s1231_s28, %s1226_s9 }
  0x4e   : > { %p1235_p10 = scmp.lt.u32.totalorder %s1226_s9, %s1521_s6 }
  0x4f   : > { %p1230_p1 = pneg %p1229_p0  ;;  %p1234_p6 = por %p1233_p13, %p1232_p4 }
  0x51   : > { %p1236_p3 = por %p1235_p10, %p1234_p6 }
  0x53   : > { %p1237_p5 = pnand %p1236_p3, %p1230_p1 }
  0x55   : > { %1240 = shalt.err (!%p1237_p5)
}
  0x56   : > { %s1241_s30 = scalar_lea.vmem %s1529_s7, 4096  ;;  %s1348_s4 = smov [#allocation2]  }
  0x57   : > { %p1242_p9 = scmp.ne.s32.totalorder %s1529_s7, %s1241_s30  ;;  %s1246_s5 = sshll.u32 %s1348_s4, 4  ;;  %s1247_s5 = int_to_ptr.vmem [resolvable:$false] %s1246_s5 }
  0x58   : > { %s1248_s21 = scalar_lea.vmem %s1247_s5, 8192  ;;  %p1249_p7 = scmp.lt.s32.totalorder %s1529_s7, %s1247_s5 }
  0x59   : > { %p1244_p11 = pnand %p1242_p9, %p1228_p12  ;;  %p1250_p4 = scmp.lt.s32.totalorder %s1248_s21, %s1241_s30 }
  0x5b   : > { %p1245_p0 = pneg %p1244_p11  ;;  %p1251_p13 = por %p1250_p4, %p1249_p7 }
  0x5d   : > { %p1252_p6 = pnand %p1251_p13, %p1245_p0 }
  0x5f   : > { %1255 = shalt.err (!%p1252_p6)
}
  0x60   : > { %s1349_s9 = smov 256   ;;  %s1350_s10 = smov 16  }
  0x61   : > { %991 = dma.hbm_to_vmem [thread:$0]  (!%p1525_p2), %s1521_s6, 4096, %s1529_s7, %s1531_s26, %s1349_s9, %s1349_s9, %s1350_s10  }
  0x62   : > { %207 = sbr.rel (%p1428_p8) target bundleno = 533 (0x215), region = 32  ;;  %s1562_s25 = sand.u32 (!%p1428_p8), 1, %s1326_s13  }
  0x63   : > { %s782_s28 = sshll.u32 (!%p1428_p8), %s1562_s25, 8  ;;  %s210_s29 = scalar_lea.sflag (!%p1428_p8), [#allocation3], %s1562_s25 }
  0x64   : > { %s1568_s11 = scalar_lea.vmem (!%p1428_p8), [#allocation2], %s782_s28  ;;  %p1718_p7 = scmp.ne.s32.totalorder (!%p1428_p8), %s1712_s22, 0 }
  0x69   : > { %1309 = dma.done.wait (%p1718_p7), %s210_s29, 4096  }
  0x6a   : > { %1311 = vsyncadd (%p1718_p7), %s210_s29, 4294963200  ;;  %p1719_p2 = scmp.ne.s32.totalorder %s1710_s20, 0 }
  0x6c   : > { %1313 = dma.done.wait (%p1719_p2), [#allocation6], 6144  }
  0x6d   : > { %1315 = vsyncadd (%p1719_p2), [#allocation6], 4294961152  ;;  %v247_v0 = vld [vmem:[%s1568_s11] sm:$0xff]  ;;  %v248_v1 = vld [vmem:[%s1568_s11 + $0x8] sm:$0xff]  ;;  %s1612_s20 = scalar_lea.vmem [#allocation8], %s782_s28  ;;  %s792_s22 = sshll.u32 %s1334_s15, 12 }
  0x6e   : > { %v249_v2 = vld [vmem:[%s1568_s11 + $0x10] sm:$0xff]  ;;  %v1058_v3 = vpack.i.bf16 %v248_v1, %v247_v0  ;;  %v250_v4 = vld [vmem:[%s1568_s11 + $0x18] sm:$0xff]  ;;  %v251_v6 = vld [vmem:[%s1568_s11 + $0x20] sm:$0xff]  ;;  %s664_s24 = sshll.u32 %s1612_s20, 4  ;;  %s1647_s8 = scalar_lea.hbm %s1705_s3, %s792_s22  ;;  %s1649_s24 = int_to_ptr.vmem [resolvable:$true] %s664_s24 }
  0x6f   : > { %v1060_v5 = vpack.i.bf16 %v250_v4, %v249_v2  ;;  %v252_v7 = vld [vmem:[%s1568_s11 + $0x28] sm:$0xff]  ;;  %v253_v9 = vld [vmem:[%s1568_s11 + $0x30] sm:$0xff]  ;;  %v254_v10 = vld [vmem:[%s1568_s11 + $0x38] sm:$0xff]  ;;  %s649_s15 = scalar_lea.sflag [#allocation4], %s1562_s25  ;;  %s1256_s26 = scalar_lea.vmem %s1649_s24, 4096 }
  0x70   : > { %1059 = vxpose.xlu0.b32.start [1/16] %v1058_v3, 128  ;;  %v1062_v8 = vpack.i.bf16 %v252_v7, %v251_v6  ;;  %v279_v11 = vld [vmem:[#allocation5] sm:$0xff]  ;;  %v1064_v12 = vpack.i.bf16 %v254_v10, %v253_v9  ;;  %v280_v13 = vld [vmem:[#allocation5 + $0x8] sm:$0xff]  ;;  %v281_v14 = vld [vmem:[#allocation5 + $0x10] sm:$0xff]  ;;  %p1257_p8 = scmp.ne.s32.totalorder %s1649_s24, %s1256_s26  ;;  %p1720_p12 = scmp.ne.s32.totalorder %s1716_s27, 0 }
  0x71   : > { %v282_v15 = vld [vmem:[#allocation5 + $0x18] sm:$0xff]  ;;  %v255_v16 = vld [vmem:[%s1568_s11 + $0x40] sm:$0xff]  ;;  %v256_v17 = vld [vmem:[%s1568_s11 + $0x48] sm:$0xff]  ;;  %v921_v18 = vpack.c.bf16 %v280_v13, %v279_v11  ;;  %s1351_s30 = smov [#allocation8]  }
  0x72   : > { %v925_v19 = vpack.c.bf16 %v282_v15, %v281_v14  ;;  %v283_v20 = vld [vmem:[#allocation5 + $0x20] sm:$0xff]  ;;  %v284_v21 = vld [vmem:[#allocation5 + $0x28] sm:$0xff]  ;;  %v1066_v22 = vpack.i.bf16 %v256_v17, %v255_v16  ;;  %v257_v23 = vld [vmem:[%s1568_s11 + $0x50] sm:$0xff]  ;;  %p1258_p1 = pnand %p1257_p8, %p1720_p12  ;;  %s1260_s4 = sshll.u32 %s1351_s30, 4  ;;  %s1261_s4 = int_to_ptr.vmem [resolvable:$false] %s1260_s4 }
  0x73   : > { %922 = vmatprep.subr.bf16.mxu0 %v921_v18  ;;  %953 = vmatprep.subr.bf16.mxu1 %v921_v18  ;;  %v258_v24 = vld [vmem:[%s1568_s11 + $0x58] sm:$0xff]  ;;  %v929_v25 = vpack.c.bf16 %v284_v21, %v283_v20  ;;  %v285_v26 = vld [vmem:[#allocation5 + $0x30] sm:$0xff]  ;;  %v259_v29 = vld [vmem:[%s1568_s11 + $0x60] sm:$0xff]  ;;  %s1262_s5 = scalar_lea.vmem %s1261_s4, 8192  ;;  %p1263_p3 = scmp.lt.s32.totalorder %s1649_s24, %s1261_s4 }
  0x74   : > { %1061 = vxpose.xlu0.b32.cont [2/16] %v1060_v5, 128  ;;  %924 = vmatpush3.bf16.msra.mxu0 %v921_v18  ;;  %v286_v27 = vld [vmem:[#allocation5 + $0x38] sm:$0xff]  ;;  %v1068_v28 = vpack.i.bf16 %v258_v24, %v257_v23  ;;  %v260_v30 = vld [vmem:[%s1568_s11 + $0x68] sm:$0xff]  ;;  %v287_v32 = vld [vmem:[#allocation5 + $0x40] sm:$0xff]  ;;  %p1259_p10 = pneg %p1258_p1  ;;  %p1264_p5 = scmp.lt.s32.totalorder %s1262_s5, %s1256_s26 }
  0x75   : > { %961 = vmatpush3.bf16.msra.mxu1 %v921_v18  ;;  %926 = vmatprep.subr.bf16.mxu0 %v925_v19  ;;  %v933_v31 = vpack.c.bf16 %v286_v27, %v285_v26  ;;  %v288_v33 = vld [vmem:[#allocation5 + $0x48] sm:$0xff]  ;;  %v1070_v34 = vpack.i.bf16 %v260_v30, %v259_v29  ;;  %v261_v35 = vld [vmem:[%s1568_s11 + $0x70] sm:$0xff]  ;;  %v262_v36 = vld [vmem:[%s1568_s11 + $0x78] sm:$0xff] }
  0x76   : > { %954 = vmatprep.subr.bf16.mxu1 %v925_v19  ;;  %v937_v37 = vpack.c.bf16 %v288_v33, %v287_v32  ;;  %v289_v38 = vld [vmem:[#allocation5 + $0x50] sm:$0xff]  ;;  %v290_v39 = vld [vmem:[#allocation5 + $0x58] sm:$0xff]  ;;  %v1072_v40 = vpack.i.bf16 %v262_v36, %v261_v35  ;;  %v263_v41 = vld [vmem:[%s1568_s11 + $0x80] sm:$0xff]  ;;  %p1265_p9 = por %p1264_p5, %p1263_p3 }
  0x77   : > { %v264_v42 = vld [vmem:[%s1568_s11 + $0x88] sm:$0xff]  ;;  %v941_v43 = vpack.c.bf16 %v290_v39, %v289_v38  ;;  %v291_v44 = vld [vmem:[#allocation5 + $0x60] sm:$0xff]  ;;  %v265_v47 = vld [vmem:[%s1568_s11 + $0x90] sm:$0xff] }
  0x78   : > { %1063 = vxpose.xlu0.b32.cont [3/16] %v1062_v8, 128  ;;  %928 = vmatpush3.bf16.msra.mxu0 %v925_v19  ;;  %v292_v45 = vld [vmem:[#allocation5 + $0x68] sm:$0xff]  ;;  %v1074_v46 = vpack.i.bf16 %v264_v42, %v263_v41  ;;  %v266_v48 = vld [vmem:[%s1568_s11 + $0x98] sm:$0xff]  ;;  %v293_v50 = vld [vmem:[#allocation5 + $0x70] sm:$0xff]  ;;  %p1266_p11 = pnand %p1265_p9, %p1259_p10 }
  0x79   : > { %962 = vmatpush3.bf16.msra.mxu1 %v925_v19  ;;  %930 = vmatprep.subr.bf16.mxu0 %v929_v25  ;;  %v945_v49 = vpack.c.bf16 %v292_v45, %v291_v44  ;;  %v294_v51 = vld [vmem:[#allocation5 + $0x78] sm:$0xff]  ;;  %v1076_v52 = vpack.i.bf16 %v266_v48, %v265_v47  ;;  %v267_v53 = vld [vmem:[%s1568_s11 + $0xa0] sm:$0xff]  ;;  %v268_v54 = vld [vmem:[%s1568_s11 + $0xa8] sm:$0xff] }
  0x7a   : > { %955 = vmatprep.subr.bf16.mxu1 %v929_v25  ;;  %v949_v55 = vpack.c.bf16 %v294_v51, %v293_v50  ;;  %v1078_v56 = vpack.i.bf16 %v268_v54, %v267_v53  ;;  %v269_v57 = vld [vmem:[%s1568_s11 + $0xb0] sm:$0xff]  ;;  %v270_v58 = vld [vmem:[%s1568_s11 + $0xb8] sm:$0xff]  ;;  %v271_v60 = vld [vmem:[%s1568_s11 + $0xc0] sm:$0xff] }
  0x7b   : > { %v1080_v59 = vpack.i.bf16 %v270_v58, %v269_v57  ;;  %v272_v61 = vld [vmem:[%s1568_s11 + $0xc8] sm:$0xff]  ;;  %v273_v63 = vld [vmem:[%s1568_s11 + $0xd0] sm:$0xff]  ;;  %v274_v0 = vld [vmem:[%s1568_s11 + $0xd8] sm:$0xff] }
  0x7c   : > { %1065 = vxpose.xlu0.b32.cont [4/16] %v1064_v12, 128  ;;  %932 = vmatpush3.bf16.msra.mxu0 %v929_v25  ;;  %v1082_v62 = vpack.i.bf16 %v272_v61, %v271_v60  ;;  %v1084_v1 = vpack.i.bf16 %v274_v0, %v273_v63  ;;  %v275_v2 = vld [vmem:[%s1568_s11 + $0xe0] sm:$0xff]  ;;  %v276_v3 = vld [vmem:[%s1568_s11 + $0xe8] sm:$0xff]  ;;  %v277_v5 = vld [vmem:[%s1568_s11 + $0xf0] sm:$0xff] }
  0x7d   : > { %963 = vmatpush3.bf16.msra.mxu1 %v929_v25  ;;  %934 = vmatprep.subr.bf16.mxu0 %v933_v31  ;;  %v1086_v4 = vpack.i.bf16 %v276_v3, %v275_v2  ;;  %v278_v6 = vld [vmem:[%s1568_s11 + $0xf8] sm:$0xff]  ;;  %v312_v57 = vld [vmem:[#allocation7 + $0x88] sm:$0xff]  ;;  %v295_v58 = vld [vmem:[#allocation7] sm:$0xff] }
  0x7e   : > { %956 = vmatprep.subr.bf16.mxu1 %v933_v31  ;;  %v1088_v7 = vpack.i.bf16 %v278_v6, %v277_v5  ;;  %v314_v5 = vld [vmem:[#allocation7 + $0x98] sm:$0xff]  ;;  %v297_v6 = vld [vmem:[#allocation7 + $0x10] sm:$0xff] }
  0x80   : > { %1067 = vxpose.xlu0.b32.cont [5/16] %v1066_v22, 128  ;;  %936 = vmatpush3.bf16.msra.mxu0 %v933_v31 }
  0x81   : > { %964 = vmatpush3.bf16.msra.mxu1 %v933_v31  ;;  %938 = vmatprep.subr.bf16.mxu0 %v937_v37 }
  0x82   : > { %957 = vmatprep.subr.bf16.mxu1 %v937_v37 }
  0x84   : > { %1069 = vxpose.xlu0.b32.cont [6/16] %v1068_v28, 128  ;;  %940 = vmatpush3.bf16.msra.mxu0 %v937_v37 }
  0x85   : > { %965 = vmatpush3.bf16.msra.mxu1 %v937_v37  ;;  %942 = vmatprep.subr.bf16.mxu0 %v941_v43 }
  0x86   : > { %958 = vmatprep.subr.bf16.mxu1 %v941_v43 }
  0x88   : > { %1071 = vxpose.xlu0.b32.cont [7/16] %v1070_v34, 128  ;;  %944 = vmatpush3.bf16.msra.mxu0 %v941_v43 }
  0x89   : > { %966 = vmatpush3.bf16.msra.mxu1 %v941_v43  ;;  %946 = vmatprep.subr.bf16.mxu0 %v945_v49 }
  0x8a   : > { %959 = vmatprep.subr.bf16.mxu1 %v945_v49 }
  0x8c   : > { %1073 = vxpose.xlu0.b32.cont [8/16] %v1072_v40, 128  ;;  %948 = vmatpush3.bf16.msra.mxu0 %v945_v49 }
  0x8d   : > { %967 = vmatpush3.bf16.msra.mxu1 %v945_v49  ;;  %950 = vmatprep.subr.bf16.mxu0 %v949_v55 }
  0x8e   : > { %960 = vmatprep.subr.bf16.mxu1 %v949_v55 }
  0x90   : > { %1075 = vxpose.xlu0.b32.cont [9/16] %v1074_v46, 128  ;;  %952 = vmatpush3.bf16.msra.mxu0 %v949_v55 }
  0x91   : > { %968 = vmatpush3.bf16.msra.mxu1 %v949_v55 }
  0x94   : > { %1077 = vxpose.xlu0.b32.cont [10/16] %v1076_v52, 128 }
  0x98   : > { %1079 = vxpose.xlu0.b32.cont [11/16] %v1078_v56, 128  ;;  %v296_v56 = vld [vmem:[#allocation7 + $0x8] sm:$0xff] }
  0x9c   : > { %1081 = vxpose.xlu0.b32.cont [12/16] %v1080_v59, 128  ;;  %v311_v59 = vld [vmem:[#allocation7 + $0x80] sm:$0xff] }
  0xa0   : > { %1083 = vxpose.xlu0.b32.cont [13/16] %v1082_v62, 128 }
  0xa4   : > { %1085 = vxpose.xlu0.b32.cont [14/16] %v1084_v1, 128 }
  0xa8   : > { %1087 = vxpose.xlu0.b32.cont [15/16] %v1086_v4, 128  ;;  %v298_v4 = vld [vmem:[#allocation7 + $0x18] sm:$0xff] }
  0xac   : > { %1089 = vxpose.xlu0.b32.end [16/16] %v1088_v7, 128  ;;  %v313_v7 = vld [vmem:[#allocation7 + $0x90] sm:$0xff] }
  0xf0   : > { %v1090_v8 = vpop.trf.xlu0 }
  0xf1   : > { %v1091_v9 = vunpack.i.l.bf16 %v1090_v8  ;;  %v1094_v10 = vunpack.i.h.bf16 %v1090_v8 }
  0xf3   : > { %873 = vmatprep.mubr.f32.mxu0 %v1091_v9  ;;  %897 = vmatprep.mubr.f32.mxu1 %v1094_v10 }
  0xf4   : > { %v1095_v11 = vpop.trf.xlu0 }
  0xf5   : > { %v1096_v12 = vunpack.i.l.bf16 %v1095_v11  ;;  %v1099_v13 = vunpack.i.h.bf16 %v1095_v11 }
  0xf7   : > { %874 = vmatmul.mubr.f32.vlgmr.msra.gmra.mrb[0].mxu0 %v1096_v12  ;;  %898 = vmatmul.mubr.f32.vlgmr.msra.gmra.mrb[0].mxu1 %v1099_v13 }
  0xf8   : > { %v1100_v14 = vpop.trf.xlu0 }
  0xf9   : > { %v1101_v15 = vunpack.i.l.bf16 %v1100_v14  ;;  %v1104_v16 = vunpack.i.h.bf16 %v1100_v14 }
  0xfb   : > { %876 = vmatprep.mubr.f32.mxu0 %v1101_v15  ;;  %900 = vmatprep.mubr.f32.mxu1 %v1104_v16  ;;  %v300_v16 = vld [vmem:[#allocation7 + $0x28] sm:$0xff] }
  0xfc   : > { %v1105_v17 = vpop.trf.xlu0 }
  0xfd   : > { %v1106_v18 = vunpack.i.l.bf16 %v1105_v17  ;;  %v1109_v19 = vunpack.i.h.bf16 %v1105_v17  ;;  %v316_v17 = vld [vmem:[#allocation7 + $0xa8] sm:$0xff] }
  0xff   : > { %877 = vmatmul.mubr.f32.gmra.mrb[2].mxu0 %v1106_v18  ;;  %901 = vmatmul.mubr.f32.gmra.mrb[2].mxu1 %v1109_v19  ;;  %v299_v18 = vld [vmem:[#allocation7 + $0x20] sm:$0xff] }
 0x100   : > { %v1110_v20 = vpop.trf.xlu0  ;;  %v315_v19 = vld [vmem:[#allocation7 + $0xa0] sm:$0xff] }
 0x101   : > { %v1111_v21 = vunpack.i.l.bf16 %v1110_v20  ;;  %v1114_v22 = vunpack.i.h.bf16 %v1110_v20 }
 0x103   : > { %879 = vmatprep.mubr.f32.mxu0 %v1111_v21  ;;  %903 = vmatprep.mubr.f32.mxu1 %v1114_v22 }
 0x104   : > { %v1115_v23 = vpop.trf.xlu0 }
 0x105   : > { %v1116_v24 = vunpack.i.l.bf16 %v1115_v23  ;;  %v1119_v25 = vunpack.i.h.bf16 %v1115_v23 }
 0x107   : > { %880 = vmatmul.mubr.f32.gmra.mrb[4].mxu0 %v1116_v24  ;;  %904 = vmatmul.mubr.f32.gmra.mrb[4].mxu1 %v1119_v25 }
 0x108   : > { %v1120_v26 = vpop.trf.xlu0 }
 0x109   : > { %v1121_v27 = vunpack.i.l.bf16 %v1120_v26  ;;  %v1124_v28 = vunpack.i.h.bf16 %v1120_v26 }
 0x10b   : > { %882 = vmatprep.mubr.f32.mxu0 %v1121_v27  ;;  %906 = vmatprep.mubr.f32.mxu1 %v1124_v28  ;;  %v302_v28 = vld [vmem:[#allocation7 + $0x38] sm:$0xff] }
 0x10c   : > { %v1125_v29 = vpop.trf.xlu0 }
 0x10d   : > { %v1126_v30 = vunpack.i.l.bf16 %v1125_v29  ;;  %v1129_v31 = vunpack.i.h.bf16 %v1125_v29  ;;  %v318_v29 = vld [vmem:[#allocation7 + $0xb8] sm:$0xff] }
 0x10f   : > { %883 = vmatmul.mubr.f32.gmra.mrb[6].mxu0 %v1126_v30  ;;  %907 = vmatmul.mubr.f32.gmra.mrb[6].mxu1 %v1129_v31  ;;  %v301_v30 = vld [vmem:[#allocation7 + $0x30] sm:$0xff] }
 0x110   : > { %v1130_v32 = vpop.trf.xlu0  ;;  %v317_v31 = vld [vmem:[#allocation7 + $0xb0] sm:$0xff] }
 0x111   : > { %v1131_v33 = vunpack.i.l.bf16 %v1130_v32  ;;  %v1134_v34 = vunpack.i.h.bf16 %v1130_v32 }
 0x113   : > { %885 = vmatprep.mubr.f32.mxu0 %v1131_v33  ;;  %909 = vmatprep.mubr.f32.mxu1 %v1134_v34 }
 0x114   : > { %v1135_v35 = vpop.trf.xlu0 }
 0x115   : > { %v1136_v36 = vunpack.i.l.bf16 %v1135_v35  ;;  %v1139_v37 = vunpack.i.h.bf16 %v1135_v35 }
 0x117   : > { %886 = vmatmul.mubr.f32.gmra.mrb[8].mxu0 %v1136_v36  ;;  %910 = vmatmul.mubr.f32.gmra.mrb[8].mxu1 %v1139_v37 }
 0x118   : > { %v1140_v38 = vpop.trf.xlu0 }
 0x119   : > { %v1141_v39 = vunpack.i.l.bf16 %v1140_v38  ;;  %v1144_v40 = vunpack.i.h.bf16 %v1140_v38 }
 0x11b   : > { %888 = vmatprep.mubr.f32.mxu0 %v1141_v39  ;;  %912 = vmatprep.mubr.f32.mxu1 %v1144_v40  ;;  %v304_v40 = vld [vmem:[#allocation7 + $0x48] sm:$0xff] }
 0x11c   : > { %v1145_v41 = vpop.trf.xlu0 }
 0x11d   : > { %v1146_v42 = vunpack.i.l.bf16 %v1145_v41  ;;  %v1149_v43 = vunpack.i.h.bf16 %v1145_v41  ;;  %v320_v41 = vld [vmem:[#allocation7 + $0xc8] sm:$0xff] }
 0x11f   : > { %889 = vmatmul.mubr.f32.gmra.mrb[10].mxu0 %v1146_v42  ;;  %913 = vmatmul.mubr.f32.gmra.mrb[10].mxu1 %v1149_v43  ;;  %v303_v42 = vld [vmem:[#allocation7 + $0x40] sm:$0xff] }
 0x120   : > { %v1150_v44 = vpop.trf.xlu0  ;;  %v319_v43 = vld [vmem:[#allocation7 + $0xc0] sm:$0xff] }
 0x121   : > { %v1151_v45 = vunpack.i.l.bf16 %v1150_v44  ;;  %v1154_v46 = vunpack.i.h.bf16 %v1150_v44 }
 0x123   : > { %891 = vmatprep.mubr.f32.mxu0 %v1151_v45  ;;  %915 = vmatprep.mubr.f32.mxu1 %v1154_v46 }
 0x124   : > { %v1155_v47 = vpop.trf.xlu0 }
 0x125   : > { %v1156_v48 = vunpack.i.l.bf16 %v1155_v47  ;;  %v1159_v49 = vunpack.i.h.bf16 %v1155_v47 }
 0x127   : > { %892 = vmatmul.mubr.f32.gmra.mrb[12].mxu0 %v1156_v48  ;;  %916 = vmatmul.mubr.f32.gmra.mrb[12].mxu1 %v1159_v49 }
 0x128   : > { %v1160_v50 = vpop.trf.xlu0 }
 0x129   : > { %v1161_v51 = vunpack.i.l.bf16 %v1160_v50  ;;  %v1164_v52 = vunpack.i.h.bf16 %v1160_v50 }
 0x12b   : > { %894 = vmatprep.mubr.f32.mxu0 %v1161_v51  ;;  %918 = vmatprep.mubr.f32.mxu1 %v1164_v52  ;;  %v306_v52 = vld [vmem:[#allocation7 + $0x58] sm:$0xff] }
 0x12c   : > { %v1165_v53 = vpop.trf.xlu0 }
 0x12d   : > { %v1169_v54 = vunpack.i.h.bf16 %v1165_v53  ;;  %v1166_v55 = vunpack.i.l.bf16 %v1165_v53  ;;  %v322_v53 = vld [vmem:[#allocation7 + $0xd8] sm:$0xff] }
 0x12f   : > { %895 = vmatmul.mubr.f32.gmra.mrb[14].mxu0 %v1166_v55  ;;  %919 = vmatmul.mubr.f32.gmra.mrb[14].mxu1 %v1169_v54  ;;  %v305_v54 = vld [vmem:[#allocation7 + $0x50] sm:$0xff] }
 0x130   : > { %v321_v55 = vld [vmem:[#allocation7 + $0xd0] sm:$0xff] }
 0x1ca   : > { %v875_v60 = vpop.f32.mrb[0].mxu0  ;;  %v899_v61 = vpop.f32.mrb[0].mxu1 }
 0x1cb   : > { %v463_v62 = vadd.f32 %v875_v60, %v296_v56  ;;  %v543_v63 = vadd.f32 %v899_v61, %v312_v57  ;;  %v457_v0 = vpop.f32.mrb[1].mxu0  ;;  %v537_v1 = vpop.f32.mrb[1].mxu1 }
 0x1cc   : > { %v458_v2 = vadd.f32 %v457_v0, %v295_v58  ;;  %v538_v3 = vadd.f32 %v537_v1, %v311_v59  ;;  %v308_v0 = vld [vmem:[#allocation7 + $0x68] sm:$0xff] }
 0x1cd   : > { %617 = vst [vmem:[%s1612_s20 + $0x8] sm:$0xff] %v463_v62  ;;  %633 = vst [vmem:[%s1612_s20 + $0x88] sm:$0xff] %v543_v63  ;;  %v324_v1 = vld [vmem:[#allocation7 + $0xe8] sm:$0xff] }
 0x1ce   : > { %616 = vst [vmem:[%s1612_s20] sm:$0xff] %v458_v2  ;;  %632 = vst [vmem:[%s1612_s20 + $0x80] sm:$0xff] %v538_v3  ;;  %v307_v2 = vld [vmem:[#allocation7 + $0x60] sm:$0xff] }
 0x1cf   : > { %v323_v3 = vld [vmem:[#allocation7 + $0xe0] sm:$0xff] }
 0x1d2   : > { %v878_v8 = vpop.f32.mrb[2].mxu0  ;;  %v902_v9 = vpop.f32.mrb[2].mxu1 }
 0x1d3   : > { %v473_v10 = vadd.f32 %v878_v8, %v298_v4  ;;  %v553_v11 = vadd.f32 %v902_v9, %v314_v5  ;;  %v467_v12 = vpop.f32.mrb[3].mxu0  ;;  %v547_v13 = vpop.f32.mrb[3].mxu1 }
 0x1d4   : > { %v468_v14 = vadd.f32 %v467_v12, %v297_v6  ;;  %v548_v15 = vadd.f32 %v547_v13, %v313_v7  ;;  %v310_v12 = vld [vmem:[#allocation7 + $0x78] sm:$0xff] }
 0x1d5   : > { %619 = vst [vmem:[%s1612_s20 + $0x18] sm:$0xff] %v473_v10  ;;  %635 = vst [vmem:[%s1612_s20 + $0x98] sm:$0xff] %v553_v11  ;;  %v326_v13 = vld [vmem:[#allocation7 + $0xf8] sm:$0xff] }
 0x1d6   : > { %618 = vst [vmem:[%s1612_s20 + $0x10] sm:$0xff] %v468_v14  ;;  %634 = vst [vmem:[%s1612_s20 + $0x90] sm:$0xff] %v548_v15  ;;  %v309_v14 = vld [vmem:[#allocation7 + $0x70] sm:$0xff] }
 0x1d7   : > { %v325_v15 = vld [vmem:[#allocation7 + $0xf0] sm:$0xff] }
 0x1da   : > { %v881_v20 = vpop.f32.mrb[4].mxu0  ;;  %v905_v21 = vpop.f32.mrb[4].mxu1 }
 0x1db   : > { %v483_v22 = vadd.f32 %v881_v20, %v300_v16  ;;  %v563_v23 = vadd.f32 %v905_v21, %v316_v17  ;;  %v477_v24 = vpop.f32.mrb[5].mxu0  ;;  %v557_v25 = vpop.f32.mrb[5].mxu1 }
 0x1dc   : > { %v478_v26 = vadd.f32 %v477_v24, %v299_v18  ;;  %v558_v27 = vadd.f32 %v557_v25, %v315_v19 }
 0x1dd   : > { %621 = vst [vmem:[%s1612_s20 + $0x28] sm:$0xff] %v483_v22  ;;  %637 = vst [vmem:[%s1612_s20 + $0xa8] sm:$0xff] %v563_v23 }
 0x1de   : > { %620 = vst [vmem:[%s1612_s20 + $0x20] sm:$0xff] %v478_v26  ;;  %636 = vst [vmem:[%s1612_s20 + $0xa0] sm:$0xff] %v558_v27 }
 0x1e2   : > { %v884_v32 = vpop.f32.mrb[6].mxu0  ;;  %v908_v33 = vpop.f32.mrb[6].mxu1 }
 0x1e3   : > { %v493_v34 = vadd.f32 %v884_v32, %v302_v28  ;;  %v573_v35 = vadd.f32 %v908_v33, %v318_v29  ;;  %v487_v36 = vpop.f32.mrb[7].mxu0  ;;  %v567_v37 = vpop.f32.mrb[7].mxu1 }
 0x1e4   : > { %v488_v38 = vadd.f32 %v487_v36, %v301_v30  ;;  %v568_v39 = vadd.f32 %v567_v37, %v317_v31 }
 0x1e5   : > { %623 = vst [vmem:[%s1612_s20 + $0x38] sm:$0xff] %v493_v34  ;;  %639 = vst [vmem:[%s1612_s20 + $0xb8] sm:$0xff] %v573_v35 }
 0x1e6   : > { %622 = vst [vmem:[%s1612_s20 + $0x30] sm:$0xff] %v488_v38  ;;  %638 = vst [vmem:[%s1612_s20 + $0xb0] sm:$0xff] %v568_v39 }
 0x1ea   : > { %v887_v44 = vpop.f32.mrb[8].mxu0  ;;  %v911_v45 = vpop.f32.mrb[8].mxu1 }
 0x1eb   : > { %v503_v46 = vadd.f32 %v887_v44, %v304_v40  ;;  %v583_v47 = vadd.f32 %v911_v45, %v320_v41  ;;  %v497_v48 = vpop.f32.mrb[9].mxu0  ;;  %v577_v49 = vpop.f32.mrb[9].mxu1 }
 0x1ec   : > { %v498_v50 = vadd.f32 %v497_v48, %v303_v42  ;;  %v578_v51 = vadd.f32 %v577_v49, %v319_v43 }
 0x1ed   : > { %625 = vst [vmem:[%s1612_s20 + $0x48] sm:$0xff] %v503_v46  ;;  %641 = vst [vmem:[%s1612_s20 + $0xc8] sm:$0xff] %v583_v47 }
 0x1ee   : > { %624 = vst [vmem:[%s1612_s20 + $0x40] sm:$0xff] %v498_v50  ;;  %640 = vst [vmem:[%s1612_s20 + $0xc0] sm:$0xff] %v578_v51 }
 0x1f2   : > { %v890_v56 = vpop.f32.mrb[10].mxu0  ;;  %v914_v57 = vpop.f32.mrb[10].mxu1 }
 0x1f3   : > { %v513_v58 = vadd.f32 %v890_v56, %v306_v52  ;;  %v593_v59 = vadd.f32 %v914_v57, %v322_v53  ;;  %v507_v60 = vpop.f32.mrb[11].mxu0  ;;  %v587_v61 = vpop.f32.mrb[11].mxu1 }
 0x1f4   : > { %v508_v62 = vadd.f32 %v507_v60, %v305_v54  ;;  %v588_v63 = vadd.f32 %v587_v61, %v321_v55 }
 0x1f5   : > { %627 = vst [vmem:[%s1612_s20 + $0x58] sm:$0xff] %v513_v58  ;;  %643 = vst [vmem:[%s1612_s20 + $0xd8] sm:$0xff] %v593_v59 }
 0x1f6   : > { %626 = vst [vmem:[%s1612_s20 + $0x50] sm:$0xff] %v508_v62  ;;  %642 = vst [vmem:[%s1612_s20 + $0xd0] sm:$0xff] %v588_v63 }
 0x1fa   : > { %v893_v4 = vpop.f32.mrb[12].mxu0  ;;  %v917_v5 = vpop.f32.mrb[12].mxu1 }
 0x1fb   : > { %v523_v6 = vadd.f32 %v893_v4, %v308_v0  ;;  %v603_v7 = vadd.f32 %v917_v5, %v324_v1  ;;  %v517_v8 = vpop.f32.mrb[13].mxu0  ;;  %v597_v9 = vpop.f32.mrb[13].mxu1 }
 0x1fc   : > { %v518_v10 = vadd.f32 %v517_v8, %v307_v2  ;;  %v598_v11 = vadd.f32 %v597_v9, %v323_v3 }
 0x1fd   : > { %629 = vst [vmem:[%s1612_s20 + $0x68] sm:$0xff] %v523_v6  ;;  %645 = vst [vmem:[%s1612_s20 + $0xe8] sm:$0xff] %v603_v7 }
 0x1fe   : > { %628 = vst [vmem:[%s1612_s20 + $0x60] sm:$0xff] %v518_v10  ;;  %644 = vst [vmem:[%s1612_s20 + $0xe0] sm:$0xff] %v598_v11 }
 0x202   : > { %v896_v16 = vpop.f32.mrb[14].mxu0  ;;  %v920_v17 = vpop.f32.mrb[14].mxu1 }
 0x203   : > { %v533_v18 = vadd.f32 %v896_v16, %v310_v12  ;;  %v613_v19 = vadd.f32 %v920_v17, %v326_v13  ;;  %v527_v20 = vpop.f32.mrb[15].mxu0  ;;  %v607_v21 = vpop.f32.mrb[15].mxu1 }
 0x204   : > { %v528_v22 = vadd.f32 %v527_v20, %v309_v14  ;;  %v608_v23 = vadd.f32 %v607_v21, %v325_v15 }
 0x205   : > { %631 = vst [vmem:[%s1612_s20 + $0x78] sm:$0xff] %v533_v18  ;;  %647 = vst [vmem:[%s1612_s20 + $0xf8] sm:$0xff] %v613_v19 }
 0x206   : > { %630 = vst [vmem:[%s1612_s20 + $0x70] sm:$0xff] %v528_v22  ;;  %646 = vst [vmem:[%s1612_s20 + $0xf0] sm:$0xff] %v608_v23 }
 0x207   : > { %1269 = shalt.err (!%p1266_p11)
}
 0x208   : > { %s1270_s21 = scalar_lea.hbm %s1647_s8, 4096  ;;  %s1274_s28 = scalar_lea.hbm %s1705_s3, 8192 }
 0x209   : > { %p1271_p0 = scmp.ne.s32.totalorder %s1647_s8, %s1270_s21  ;;  %p1275_p6 = scmp.lt.u32.totalorder %s1647_s8, %s1705_s3 }
 0x20a   : > { %p1276_p7 = scmp.lt.u32.totalorder %s1274_s28, %s1270_s21  ;;  %p1278_p8 = scmp.lt.u32.totalorder %s1270_s21, %s1647_s8 }
 0x20b   : > { %p1272_p4 = pnand %p1271_p0, %p1720_p12 }
 0x20c   : > { %p1277_p2 = por %p1276_p7, %p1275_p6 }
 0x20d   : > { %p1273_p13 = pneg %p1272_p4 }
 0x20e   : > { %p1279_p1 = por %p1278_p8, %p1277_p2 }
 0x210   : > { %p1280_p10 = pnand %p1279_p1, %p1273_p13 }
 0x212   : > { %1283 = shalt.err (!%p1280_p10)
}
 0x213   : > { %s1352_s20 = smov 128   ;;  %s1353_s22 = smov 8  }
 0x214   : > { %979 = dma.vmem_to_hbm [thread:$0]  (%p1720_p12), %s1649_s24, 4096, %s1647_s8, %s649_s15, %s1352_s20, %s1352_s20, %s1353_s22  }
 0x215 PF: > { %s679_s6 = sand.u32 1, %s1322_s12   ;;  %p1721_p3 = scmp.ne.s32.totalorder %s1713_s23, 0 }
 0x216   : > { %p1722_p5 = scmp.ge.s32.totalorder %s1342_s17, 2  ;;  %s680_s7 = scalar_lea.sflag [#allocation4], %s679_s6 }
 0x218   : > { %p993_p9 = pnand %p1722_p5, %p1721_p3 }
 0x21a   : > { %1317 = dma.done.wait (!%p993_p9), %s680_s7, 4096  }
 0x21b   : > { %1319 = vsyncadd (!%p993_p9), %s680_s7, 4294963200  ;;  %s20_s17 = sadd.s32 1, %s1342_s17   ;;  %s1723_s12 = smov %s1326_s13 }
 0x21c   : > { %p17_p11 = scmp.ge.s32.totalorder %s20_s17, 4   ;;  %s1724_s13 = smov %s1330_s14 }
 0x21d   : > { %s1725_s14 = smov %s1516_s18  ;;  %s1726_s15 = smov %s1338_s16 }
 0x21e   : > { %s1727_s16 = smov %s1729_s19  ;;  %19 = sbr.rel (!%p17_p11) target bundleno = 7 (0x7), region = 86 }
 0x225   :  { %685 = vsyncpa [#allocation3], 1 }
 0x226   :  { %687 = vsyncpa [#allocation3 + $0x1], 1 }
 0x227   :  { %688 = vsyncpa [#allocation6], 1 }
 0x228   :  { %689 = vsyncpa [#allocation4], 1 }
 0x229   :  { %691 = vsyncpa [#allocation4 + $0x1], 1 }

</bundles_post_ra>
